<compile_context>
chip_gen: v7x
topology: tpu7x:2x2x1
jax: 0.10.0
libtpu: 0.0.40
codegen_flags: <defaults>
</compile_context>

<pallas_src>
import functools

import jax
import jax.numpy as jnp
from jax import lax
from jax.experimental import pallas as pl
from jax.experimental.pallas import tpu as pltpu

_SQRT2 = 1.4142135623730951
_EPS = 1e-6


def _gelu(x, approximate):
    if approximate:
        # tanh-approx GELU: the transcendental runs on the EUP slot (free next
        # to the matmuls) instead of a long erf polynomial on the VALU.
        return jax.nn.gelu(x, approximate=True)
    # Exact erf GELU: matches torch.nn.GELU() default (approximate='none').
    return 0.5 * x * (1.0 + lax.erf(x / _SQRT2))


def _mlp_kernel(n_hidden, approx_gelu, compute_dtype, *refs):
    """refs = (x_ref, [w_i, b_i] * n_hidden, w_final, b_final, o_ref)."""
    x_ref = refs[0]
    o_ref = refs[-1]
    p_refs = refs[1:-1]

    # Activations live in f32; matmul inputs are cast to compute_dtype
    # (bf16 on the fast path) with f32 accumulation on the MXU.
    h = x_ref[...].astype(jnp.float32)

    for i in range(n_hidden):
        w = p_refs[2 * i][...]                          # (in, out) compute_dtype
        b = p_refs[2 * i + 1][...].astype(jnp.float32)  # (1, out) broadcasts
        z = jnp.dot(h.astype(compute_dtype), w,
                    preferred_element_type=jnp.float32) + b
        h = _gelu(z, approx_gelu)

    # L2Norm over the feature axis (PyTorch dim=1) with clamp(min=eps).
    # rsqrt(max(sumsq, eps^2)) == 1 / clamp(||h||, eps); rsqrt goes to the EUP.
    sumsq = jnp.sum(h * h, axis=1, keepdims=True)
    h = h * lax.rsqrt(jnp.maximum(sumsq, _EPS * _EPS))

    # Final projection (output columns are zero-padded to 128 lanes so the
    # store is an unmasked, lane-dense vst).
    wf = p_refs[-2][...]
    bf = p_refs[-1][...].astype(jnp.float32)
    out = jnp.dot(h.astype(compute_dtype), wf,
                  preferred_element_type=jnp.float32) + bf
    o_ref[...] = out.astype(o_ref.dtype)


def prepare_mlp_params(hidden_params, final_w, final_b, *,
                       compute_dtype=jnp.bfloat16):
    """One-time weight cast / pad, hoisted out of the per-call forward path.

    hidden_params: list of (W[in, out], b[out]) for the GELU layers.
    final_w/final_b: the post-L2Norm projection.
    Returns a dict consumed by mlp_forward; build once, reuse every call.
    """
    hidden = []
    for w, b in hidden_params:
        hidden.append((jnp.asarray(w).astype(compute_dtype),
                       jnp.asarray(b).reshape(1, -1).astype(jnp.float32)))

    dim_out = final_w.shape[1]
    out_pad = max(128, pl.cdiv(dim_out, 128) * 128)
    wf = jnp.pad(jnp.asarray(final_w),
                 ((0, 0), (0, out_pad - dim_out))).astype(compute_dtype)
    bf = jnp.pad(jnp.asarray(final_b),
                 (0, out_pad - dim_out)).reshape(1, -1).astype(jnp.float32)

    return {
        "hidden": hidden,
        "final_w": wf,
        "final_b": bf,
        "dim_out": dim_out,
        "out_pad": out_pad,
        "compute_dtype": compute_dtype,
    }


def _auto_tile_b(batch):
    """Batch-tile heuristic.

    Target grid_b == 2: keeps both v7x TensorCores busy via the "parallel"
    batch axis, limits per-step pipeline overhead to two steps on single-core
    chips, and for B >= 512 gives the v6e MXU an M of >= 256.  Prefer a tile
    that exactly divides B so x needs no pad copy in HBM.
    """
    if batch >= 16 and batch % 16 == 0:
        return batch // 2            # grid_b = 2, no padding
    if batch % 8 == 0:
        return batch                 # grid_b = 1, no padding
    # Ragged batch: two roughly-equal tiles, pad only the last few rows.
    return max(8, (((batch + 1) // 2) + 7) // 8 * 8)


def _vmem_estimate_bytes(params, tile_b, dim):
    """Rough resident-VMEM budget: 2x (double-buffered) weights + tiles."""
    nbytes = lambda a: a.size * a.dtype.itemsize
    w_bytes = sum(nbytes(w) + nbytes(b) for w, b in params["hidden"])
    w_bytes += nbytes(params["final_w"]) + nbytes(params["final_b"])
    widths = [dim] + [w.shape[1] for w, _ in params["hidden"]] + [params["out_pad"]]
    tile_bytes = 2 * tile_b * (dim + params["out_pad"]) * 4      # x / out tiles, 2-buf
    act_bytes = 3 * tile_b * max(widths) * 4                     # f32 intermediates
    return 2 * w_bytes + tile_bytes + act_bytes


def mlp_forward(x, params, *, tile_b=None, approx_gelu=True,
                vmem_limit_bytes=None):
    """x: [B, dim] f32.  params: output of prepare_mlp_params.

    Returns [B, dim_out] f32.
    """
    B, dim = x.shape
    hidden = params["hidden"]
    wf, bf = params["final_w"], params["final_b"]
    dim_out = params["dim_out"]
    out_pad = params["out_pad"]
    compute_dtype = params["compute_dtype"]

    # ---- batch tiling (prefer divisors of B; pad only for ragged batches).
    if tile_b is None:
        tile_b = _auto_tile_b(B)
    tile_b = max(8, min(tile_b, ((B + 7) // 8) * 8))
    grid_b = pl.cdiv(B, tile_b)
    b_pad = grid_b * tile_b
    x_p = x if b_pad == B else jnp.pad(x, ((0, b_pad - B), (0, 0)))

    flat_inputs = [x_p]
    in_specs = [pl.BlockSpec((tile_b, dim), lambda i: (i, 0))]
    for w, b in hidden:
        flat_inputs += [w, b]
        # Constant index_map -> DMA'd once, VMEM-resident across grid steps.
        in_specs += [pl.BlockSpec(w.shape, lambda i: (0, 0)),
                     pl.BlockSpec(b.shape, lambda i: (0, 0))]
    flat_inputs += [wf, bf]
    in_specs += [pl.BlockSpec(wf.shape, lambda i: (0, 0)),
                 pl.BlockSpec(bf.shape, lambda i: (0, 0))]

    out_specs = pl.BlockSpec((tile_b, out_pad), lambda i: (i, 0))

    if vmem_limit_bytes is None:
        est = _vmem_estimate_bytes(params, tile_b, dim)
        # Floor at the 32 MiB scoped default; cap at 64 MiB to stay inside
        # v7x physical VMEM.  On v5e/v6e (128 MiB) callers may pass more.
        vmem_limit_bytes = min(max(32 << 20, 2 * est), 64 << 20)

    kernel = functools.partial(_mlp_kernel, len(hidden), approx_gelu,
                               compute_dtype)

    out = pl.pallas_call(
        kernel,
        out_shape=jax.ShapeDtypeStruct((b_pad, out_pad), jnp.float32),
        grid=(grid_b,),
        in_specs=in_specs,
        out_specs=out_specs,
        compiler_params=pltpu.CompilerParams(
            # Batch axis is embarrassingly parallel -> megacore shard on v7x
            # (grid_b is kept even by the auto tile picker).
            dimension_semantics=("parallel",),
            vmem_limit_bytes=vmem_limit_bytes,
        ),
    )(*flat_inputs)

    return out[:B, :dim_out]


def _init_linear(key, fan_in, fan_out):
    # PyTorch nn.Linear default init: U(-1/sqrt(fan_in), 1/sqrt(fan_in)).
    kw, kb = jax.random.split(key)
    bound = 1.0 / jnp.sqrt(fan_in)
    w = jax.random.uniform(kw, (fan_in, fan_out), jnp.float32, -bound, bound)
    b = jax.random.uniform(kb, (fan_out,), jnp.float32, -bound, bound)
    return w, b


def _reference_forward(x, hidden_params, final_w, final_b):
    h = x
    for w, b in hidden_params:
        h = h @ w + b
        h = 0.5 * h * (1.0 + lax.erf(h / _SQRT2))
    norm = jnp.maximum(jnp.linalg.norm(h, axis=1, keepdims=True), _EPS)
    h = h / norm
    return h @ final_w + final_b


if __name__ == "__main__":
    # MLP(dim=32, dim_out=16, num_layers=3, hidden_size=64)
    # -> Linear(32,64)+GELU, Linear(64,64)+GELU, L2Norm, Linear(64,16)
    batch, dim, dim_out, num_layers, hidden_size = 64, 32, 16, 3, 64

    key = jax.random.PRNGKey(0)
    kx, *pkeys = jax.random.split(key, 1 + num_layers)

    x = jax.random.normal(kx, (batch, dim), jnp.float32)

    dims = (dim,) + (hidden_size,) * (num_layers - 1)
    hidden_params = []
    for i, (d_in, d_out) in enumerate(zip(dims[:-1], dims[1:])):
        hidden_params.append(_init_linear(pkeys[i], d_in, d_out))
    final_w, final_b = _init_linear(pkeys[-1], hidden_size, dim_out)

    ref = _reference_forward(x, hidden_params, final_w, final_b)

    # One-time weight preparation (hoisted out of the forward path).
    params_exact = prepare_mlp_params(hidden_params, final_w, final_b,
                                      compute_dtype=jnp.float32)
    params_fast = prepare_mlp_params(hidden_params, final_w, final_b,
                                     compute_dtype=jnp.bfloat16)

    # Exact path: f32 matmuls + erf GELU (torch.nn.GELU default semantics).
    out_exact = mlp_forward(x, params_exact, approx_gelu=False)
    out_exact = jax.block_until_ready(out_exact)
    assert out_exact.shape == (batch, dim_out)
    assert jnp.allclose(out_exact, ref, rtol=1e-4, atol=1e-4), \
        "exact-path mismatch vs JAX reference"

    # Fast path (perf default): bf16 MXU inputs + tanh-approx GELU.
    # NOTE: intentionally deviates from torch.nn.GELU(approximate='none');
    # ~3e-2 tolerance regime.
    out_fast = mlp_forward(x, params_fast, approx_gelu=True)
    out_fast = jax.block_until_ready(out_fast)
    assert out_fast.shape == (batch, dim_out)
    assert jnp.allclose(out_fast, ref, rtol=3e-2, atol=3e-2), \
        "fast-path mismatch vs JAX reference"

    # Ragged batch (exercises the pad-last-tile fallback).
    b_ragged = 50
    out_ragged = mlp_forward(x[:b_ragged], params_exact, approx_gelu=False)
    out_ragged = jax.block_until_ready(out_ragged)
    assert out_ragged.shape == (b_ragged, dim_out)
    assert jnp.allclose(out_ragged, ref[:b_ragged], rtol=1e-4, atol=1e-4), \
        "ragged-batch mismatch vs JAX reference"

    print("KERNEL_OK")
</pallas_src>

<mosaic_0001>
module attributes {stable_mosaic.version = 11 : i64} {
  func.func @_mlp_kernel(%arg0: i32, %arg1: memref<32x32xf32, #tpu.memory_space<vmem>>, %arg2: memref<32x64xf32, #tpu.memory_space<vmem>>, %arg3: memref<1x64xf32, #tpu.memory_space<vmem>>, %arg4: memref<64x64xf32, #tpu.memory_space<vmem>>, %arg5: memref<1x64xf32, #tpu.memory_space<vmem>>, %arg6: memref<64x128xf32, #tpu.memory_space<vmem>>, %arg7: memref<1x128xf32, #tpu.memory_space<vmem>>, %arg8: memref<32x128xf32, #tpu.memory_space<vmem>>) attributes {dimension_semantics = [#tpu.dimension_semantics<parallel>], iteration_bounds = array<i64: 2>, scalar_prefetch = 0 : i64, scratch_operands = 0 : i64, tpu.core_type = #tpu.core_type<tc>, window_params = [{transform_indices = @transform_0, window_bounds = array<i64: 32, 32>}, {pipeline_mode = #tpu.pipeline_mode<synchronous>, transform_indices = @transform_1, window_bounds = array<i64: 32, 64>}, {pipeline_mode = #tpu.pipeline_mode<synchronous>, transform_indices = @transform_2, window_bounds = array<i64: 1, 64>}, {pipeline_mode = #tpu.pipeline_mode<synchronous>, transform_indices = @transform_3, window_bounds = array<i64: 64, 64>}, {pipeline_mode = #tpu.pipeline_mode<synchronous>, transform_indices = @transform_4, window_bounds = array<i64: 1, 64>}, {pipeline_mode = #tpu.pipeline_mode<synchronous>, transform_indices = @transform_5, window_bounds = array<i64: 64, 128>}, {pipeline_mode = #tpu.pipeline_mode<synchronous>, transform_indices = @transform_6, window_bounds = array<i64: 1, 128>}, {transform_indices = @transform_7, window_bounds = array<i64: 32, 128>}]} {
    %c0 = arith.constant 0 : index
    %c0_0 = arith.constant 0 : index
    %0 = vector.load %arg1[%c0, %c0_0] : memref<32x32xf32, #tpu.memory_space<vmem>>, vector<32x32xf32>
    %c0_1 = arith.constant 0 : index
    %c0_2 = arith.constant 0 : index
    %1 = vector.load %arg2[%c0_1, %c0_2] : memref<32x64xf32, #tpu.memory_space<vmem>>, vector<32x64xf32>
    %c0_3 = arith.constant 0 : index
    %c0_4 = arith.constant 0 : index
    %2 = vector.load %arg3[%c0_3, %c0_4] : memref<1x64xf32, #tpu.memory_space<vmem>>, vector<1x64xf32>
    %cst = arith.constant dense<0.000000e+00> : vector<32x64xf32>
    %3 = tpu.matmul %0, %1, %cst {dimension_numbers = #tpu.dot_dimension_numbers<[1], [0], [0], [1], [0, 0, 1, 1], [], []>} : vector<32x32xf32>, vector<32x64xf32>, vector<32x64xf32> -> vector<32x64xf32>
    %4 = vector.broadcast %2 : vector<1x64xf32> to vector<32x64xf32>
    %5 = arith.addf %3, %4 : vector<32x64xf32>
    %cst_5 = arith.constant 5.000000e-01 : f32
    %6 = vector.broadcast %cst_5 : f32 to vector<32x64xf32>
    %7 = arith.mulf %6, %5 : vector<32x64xf32>
    %cst_6 = arith.constant 1.41421354 : f32
    %8 = vector.broadcast %cst_6 : f32 to vector<32x64xf32>
    %9 = arith.divf %5, %8 : vector<32x64xf32>
    %10 = math.erf %9 : vector<32x64xf32>
    %cst_7 = arith.constant 1.000000e+00 : f32
    %11 = vector.broadcast %cst_7 : f32 to vector<32x64xf32>
    %12 = arith.addf %11, %10 : vector<32x64xf32>
    %13 = arith.mulf %7, %12 : vector<32x64xf32>
    %c0_8 = arith.constant 0 : index
    %c0_9 = arith.constant 0 : index
    %14 = vector.load %arg4[%c0_8, %c0_9] : memref<64x64xf32, #tpu.memory_space<vmem>>, vector<64x64xf32>
    %c0_10 = arith.constant 0 : index
    %c0_11 = arith.constant 0 : index
    %15 = vector.load %arg5[%c0_10, %c0_11] : memref<1x64xf32, #tpu.memory_space<vmem>>, vector<1x64xf32>
    %cst_12 = arith.constant dense<0.000000e+00> : vector<32x64xf32>
    %16 = tpu.matmul %13, %14, %cst_12 {dimension_numbers = #tpu.dot_dimension_numbers<[1], [0], [0], [1], [0, 0, 1, 1], [], []>} : vector<32x64xf32>, vector<64x64xf32>, vector<32x64xf32> -> vector<32x64xf32>
    %17 = vector.broadcast %15 : vector<1x64xf32> to vector<32x64xf32>
    %18 = arith.addf %16, %17 : vector<32x64xf32>
    %cst_13 = arith.constant 5.000000e-01 : f32
    %19 = vector.broadcast %cst_13 : f32 to vector<32x64xf32>
    %20 = arith.mulf %19, %18 : vector<32x64xf32>
    %cst_14 = arith.constant 1.41421354 : f32
    %21 = vector.broadcast %cst_14 : f32 to vector<32x64xf32>
    %22 = arith.divf %18, %21 : vector<32x64xf32>
    %23 = math.erf %22 : vector<32x64xf32>
    %cst_15 = arith.constant 1.000000e+00 : f32
    %24 = vector.broadcast %cst_15 : f32 to vector<32x64xf32>
    %25 = arith.addf %24, %23 : vector<32x64xf32>
    %26 = arith.mulf %20, %25 : vector<32x64xf32>
    %27 = arith.mulf %26, %26 : vector<32x64xf32>
    %cst_16 = arith.constant dense<0.000000e+00> : vector<32xf32>
    %28 = vector.multi_reduction <add>, %27, %cst_16 [1] : vector<32x64xf32> to vector<32xf32>
    %29 = vector.shape_cast %28 : vector<32xf32> to vector<32x1xf32>
    %cst_17 = arith.constant 9.99999996E-13 : f32
    %30 = vector.broadcast %cst_17 : f32 to vector<32x1xf32>
    %31 = arith.maximumf %29, %30 : vector<32x1xf32>
    %32 = math.rsqrt %31 : vector<32x1xf32>
    %33 = vector.broadcast %32 : vector<32x1xf32> to vector<32x64xf32>
    %34 = arith.mulf %26, %33 : vector<32x64xf32>
    %c0_18 = arith.constant 0 : index
    %c0_19 = arith.constant 0 : index
    %35 = vector.load %arg6[%c0_18, %c0_19] : memref<64x128xf32, #tpu.memory_space<vmem>>, vector<64x128xf32>
    %c0_20 = arith.constant 0 : index
    %c0_21 = arith.constant 0 : index
    %36 = vector.load %arg7[%c0_20, %c0_21] : memref<1x128xf32, #tpu.memory_space<vmem>>, vector<1x128xf32>
    %cst_22 = arith.constant dense<0.000000e+00> : vector<32x128xf32>
    %37 = tpu.matmul %34, %35, %cst_22 {dimension_numbers = #tpu.dot_dimension_numbers<[1], [0], [0], [1], [0, 0, 1, 1], [], []>} : vector<32x64xf32>, vector<64x128xf32>, vector<32x128xf32> -> vector<32x128xf32>
    %38 = vector.broadcast %36 : vector<1x128xf32> to vector<32x128xf32>
    %39 = arith.addf %37, %38 : vector<32x128xf32>
    %c0_23 = arith.constant 0 : index
    %c0_24 = arith.constant 0 : index
    %40 = vector.load %arg8[%c0_23, %c0_24] : memref<32x128xf32, #tpu.memory_space<vmem>>, vector<32x128xf32>
    tpu.vector_store %arg8[%c0_23, %c0_24], %39 {strides = array<i32>} : memref<32x128xf32, #tpu.memory_space<vmem>>, vector<32x128xf32>,
    return
  }
  func.func @transform_0(%arg0: i32) -> (i32, i32) {
    %c0_i32 = arith.constant 0 : i32
    %c0_i32_0 = arith.constant 0 : i32
    return %arg0, %c0_i32 : i32, i32
  }
  func.func @transform_1(%arg0: i32) -> (i32, i32) {
    %c0_i32 = arith.constant 0 : i32
    %c0_i32_0 = arith.constant 0 : i32
    %c0_i32_1 = arith.constant 0 : i32
    return %c0_i32, %c0_i32_0 : i32, i32
  }
  func.func @transform_2(%arg0: i32) -> (i32, i32) {
    %c0_i32 = arith.constant 0 : i32
    %c0_i32_0 = arith.constant 0 : i32
    %c0_i32_1 = arith.constant 0 : i32
    return %c0_i32, %c0_i32_0 : i32, i32
  }
  func.func @transform_3(%arg0: i32) -> (i32, i32) {
    %c0_i32 = arith.constant 0 : i32
    %c0_i32_0 = arith.constant 0 : i32
    %c0_i32_1 = arith.constant 0 : i32
    return %c0_i32, %c0_i32_0 : i32, i32
  }
  func.func @transform_4(%arg0: i32) -> (i32, i32) {
    %c0_i32 = arith.constant 0 : i32
    %c0_i32_0 = arith.constant 0 : i32
    %c0_i32_1 = arith.constant 0 : i32
    return %c0_i32, %c0_i32_0 : i32, i32
  }
  func.func @transform_5(%arg0: i32) -> (i32, i32) {
    %c0_i32 = arith.constant 0 : i32
    %c0_i32_0 = arith.constant 0 : i32
    %c0_i32_1 = arith.constant 0 : i32
    return %c0_i32, %c0_i32_0 : i32, i32
  }
  func.func @transform_6(%arg0: i32) -> (i32, i32) {
    %c0_i32 = arith.constant 0 : i32
    %c0_i32_0 = arith.constant 0 : i32
    %c0_i32_1 = arith.constant 0 : i32
    return %c0_i32, %c0_i32_0 : i32, i32
  }
  func.func @transform_7(%arg0: i32) -> (i32, i32) {
    %c0_i32 = arith.constant 0 : i32
    %c0_i32_0 = arith.constant 0 : i32
    return %arg0, %c0_i32 : i32, i32
  }
}

</mosaic_0001>

<bundles_post_ra>
// kernel: tpu_custom_call.1
= control target key start
LH: loop header
LB: loop body
LE: loop exit
PB: predicated region body
PF: predicated region fallthrough
CT: control target
= control target key end

     0   :  { %12 = vsyncpa [#allocation3], 0  ;;  %s1372_s0 = inlined_call_operand.vmem [shape: f32[64,32], index: 0, kind: input, shape index: {}]   ;;  %s1373_s1 = inlined_call_operand.vmem [shape: f32[32,64], index: 1, kind: input, shape index: {}]   ;;  %s1374_s2 = inlined_call_operand.vmem [shape: f32[1,64], index: 2, kind: input, shape index: {}]   ;;  %s1375_s3 = inlined_call_operand.vmem [shape: f32[64,64], index: 3, kind: input, shape index: {}]   ;;  %s1376_s4 = inlined_call_operand.vmem [shape: f32[1,64], index: 4, kind: input, shape index: {}]   ;;  %s1377_s5 = inlined_call_operand.hbm [shape: f32[64,128], index: 5, kind: input, shape index: {}]   ;;  %s1378_s6 = inlined_call_operand.vmem [shape: f32[1,128], index: 6, kind: input, shape index: {}]   ;;  %s1379_s7 = inlined_call_operand.hbm [shape: f32[64,128], index: 7, kind: output, shape index: {}]  }
   0x1   :  { %13 = vsyncpa [#allocation4], 0 }
   0x2   :  { %15 = vsyncpa [#allocation4 + $0x1], 0  ;;  %s1174_s24 = smov 0   ;;  %s1176_s25 = smov 0  }
   0x3   :  { %s1178_s26 = smov 0   ;;  %s1180_s27 = smov 0  }
   0x4 LB: > { %s1195_s28 = sadd.s32 4294967295, %s1126_s27   ;;  %s794_s29 = sadd.s32 4294967294, %s1126_s27   ;;  %s1126_s27 = sphi %s1180_s27, %s1395_s27   ;;  %s1122_s26 = sphi %s1178_s26, %s1394_s26   ;;  %s1118_s25 = sphi %s1176_s25, %s1393_s25   ;;  %s1114_s24 = sphi %s1174_s24, %s1392_s24  }
   0x5   : > { %s1199_s30 = sadd.s32 1, %s1126_s27   ;;  %s180_s8 = sadd.s32 1, %s1122_s26 }
   0x6   : > { %s177_s9 = ssub.s32 %s1126_s27, %s1199_s30  ;;  %p190_p0 = scmp.ne.s32.totalorder %s1122_s26, %s1118_s25 }
   0x7   : > { %p178_p1 = scmp.eq.s32.totalorder %s177_s9, 0  ;;  %p191_p2 = scmp.eq.s32.totalorder %s1195_s28, 1 }
   0x8   : > { %p196_p3 = scmp.ne.s32.totalorder %s1118_s25, %s1114_s24  ;;  %p197_p4 = scmp.eq.s32.totalorder %s794_s29, 1 }
   0x9   : > { %s1210_s10 = scalar_select %p178_p1, %s1122_s26, %s180_s8  }
   0xa   : > { %p1212_p5 = por %p191_p2, %p190_p0  ;;  %p1216_p6 = por %p197_p4, %p196_p3 }
   0xb   : > { %p795_p7 = scmp.ge.s32.totalorder %s1126_s27, 1  ;;  %p204_p8 = scmp.lt.s32.totalorder %s1126_s27, 3 }
   0xc   : > { %s1383_s11 = scalar_select %p1212_p5, 1, 0 }
   0xd   : > { %s1384_s12 = scalar_select %p1216_p6, 1, 0 }
   0xe   : > { %p1380_p9 = scmp.eq.s32.totalorder %s1195_s28, 0  ;;  %p1223_p10 = pnand %p795_p7, %p204_p8 }
   0xf   : > { %s1128_s14 = smov [#allocation2]   ;;  %s1032_s19 = scalar_lea.hbm %s1377_s5, 1024 }
  0x10   : > { %s1385_s13 = scalar_select %p1223_p10, 1, 0 }
  0x11   : > { %s228_s15 = sshll.u32 %s1128_s14, 4  ;;  %p960_p11 = pneg %p1223_p10  ;;  %s229_s15 = int_to_ptr.vmem [resolvable:$true] %s228_s15 }
  0x12   : > { %p1033_p13 = scmp.ne.s32.totalorder %s1377_s5, %s1032_s19  ;;  %p1039_p3 = scmp.lt.u32.totalorder %s1032_s19, %s1377_s5 }
  0x13   : > { %p1231_p12 = pnand %p1380_p9, %p960_p11 }
  0x15   : > { %p1034_p0 = pneg %p1231_p12 }
  0x17   : > { %p1035_p1 = pnand %p1034_p0, %p1033_p13 }
  0x19   : > { %p1036_p2 = pneg %p1035_p1 }
  0x1b   : > { %p1041_p4 = pnand %p1039_p3, %p1036_p2 }
  0x1d   : > { %1044 = shalt.err (!%p1041_p4)
}
  0x1e   : > { %s1045_s29 = scalar_lea.vmem %s229_s15, 1024  ;;  %p1053_p9 = scmp.lt.s32.totalorder %s229_s15, %s229_s15 }
  0x1f   : > { %p1046_p7 = scmp.ne.s32.totalorder %s229_s15, %s1045_s29  ;;  %p1054_p6 = scmp.lt.s32.totalorder %s1045_s29, %s1045_s29 }
  0x21   : > { %p1048_p8 = pnand %p1046_p7, %p1034_p0  ;;  %p1055_p5 = por %p1054_p6, %p1053_p9 }
  0x23   : > { %p1049_p11 = pneg %p1048_p8 }
  0x25   : > { %p1056_p10 = pnand %p1055_p5, %p1049_p11 }
  0x27   : > { %1059 = shalt.err (!%p1056_p10)
}
  0x28   : > { %s1129_s8 = smov 128   ;;  %s1130_s9 = smov 8  }
  0x29   : > { %963 = dma.hbm_to_vmem [thread:$0]  (!%p1231_p12), %s1377_s5, 1024, %s229_s15, [#allocation3], %s1129_s8, %s1129_s8, %s1130_s9  }
  0x2a   : > { %p1387_p13 = scmp.ne.s32.totalorder %s1385_s13, 0 }
  0x2b   : > { %p1388_p1 = scmp.eq.s32.totalorder (!%p1387_p13), %s1195_s28, 0 }
  0x2c   : > { %256 = sbr.rel (%p1387_p13) target bundleno = 927 (0x39f), region = 48 }
  0x33   : > { %1105 = dma.done.wait (%p1388_p1), [#allocation3], 1024   ;;  %p1389_p0 = pmov %p1388_p1 }
  0x34   : > { %s801_s18 = sshll.u32 %s1195_s28, 2  ;;  %vm310_vm0 = vcmask 261120   ;;  %v299_v0 = vld [vmem:[%s1373_s1] sm:$0xff]  ;;  %v300_v1 = vld [vmem:[%s1373_s1 + $0x8] sm:$0xff]  ;;  %v301_v2 = vld [vmem:[%s1373_s1 + $0x10] sm:$0xff]  ;;  %vm444_vm1 = vcmask 523264  }
  0x35   : > { %1107 = vsyncadd (%p1389_p0), [#allocation3], 4294966272  ;;  %p289_p5 = scmp.lt.s32.totalorder %s801_s18, 7  ;;  %v914_v3 = vpack.c.bf16 %v300_v1, %v299_v0  ;;  %v302_v4 = vld [vmem:[%s1373_s1 + $0x18] sm:$0xff]  ;;  %v429_v10 = vld [vmem:[%s1375_s3] sm:$0xff]  ;;  %s285_s22 = sand.u32 1, %s1118_s25  }
  0x36   : > { %v918_v6 = vpack.c.bf16 %v302_v4, %v301_v2  ;;  %v430_v11 = vld [vmem:[%s1375_s3 + $0x8] sm:$0xff]  ;;  %v431_v13 = vld [vmem:[%s1375_s3 + $0x10] sm:$0xff]  ;;  %v432_v14 = vld [vmem:[%s1375_s3 + $0x18] sm:$0xff]  ;;  %s800_s13 = sshll.u32 %s285_s22, 5  ;;  %s823_s9 = sshll.u32 %s1195_s28, 9 }
  0x37   : > { %s1397_s18 = smov (!%p289_p5, %s801_s18), 7  ;;  %915 = vmatprep.subr.bf16.mxu0 %v914_v3  ;;  %v922_v12 = vpack.c.bf16 %v430_v11, %v429_v10  ;;  %v926_v15 = vpack.c.bf16 %v432_v14, %v431_v13  ;;  %v433_v16 = vld [vmem:[%s1375_s3 + $0x20] sm:$0xff]  ;;  %v434_v17 = vld [vmem:[%s1375_s3 + $0x28] sm:$0xff]  ;;  %v435_v19 = vld [vmem:[%s1375_s3 + $0x30] sm:$0xff]  ;;  %s287_s29 = scalar_lea.vmem [#allocation5], %s800_s13 }
  0x38   : > { %s802_s19 = sshll.u32 %s1397_s18, 3  ;;  %917 = vmatpush3.bf16.msra.mxu0 %v914_v3  ;;  %v930_v18 = vpack.c.bf16 %v434_v17, %v433_v16  ;;  %v436_v20 = vld [vmem:[%s1375_s3 + $0x38] sm:$0xff]  ;;  %v803_v22 = vld [vmem:[%s1374_s2] ss:$0 sm:$0xff]  ;;  %s720_s8 = sshll.u32 %s287_s29, 4  ;;  %s1324_s8 = int_to_ptr.vmem [resolvable:$true] %s720_s8 }
  0x39   : > { %s292_s21 = scalar_lea.vmem %s1372_s0, %s802_s19  ;;  %919 = vmatprep.subr.bf16.mxu0 %v918_v6  ;;  %923 = vmatprep.subr.bf16.mxu1 %v922_v12  ;;  %v934_v21 = vpack.c.bf16 %v436_v20, %v435_v19  ;;  %v808_v51 = vld [vmem:[%s1376_s4] ss:$0 sm:$0xff]  ;;  %s1329_s18 = scalar_lea.hbm %s1379_s7, %s823_s9 }
  0x3a   : > { %v295_v5 = vld [vmem:[%s292_s21] sm:$0xff]  ;;  %v296_v7 = vld [vmem:[%s292_s21 + $0x8] sm:$0xff]  ;;  %v297_v8 = vld [vmem:[%s292_s21 + $0x10] sm:$0xff]  ;;  %925 = vmatpush3.bf16.msra.mxu1 %v922_v12  ;;  %s1331_s19 = scalar_lea.sflag [#allocation4], %s285_s22  ;;  %s1060_s28 = scalar_lea.vmem %s1324_s8, 512 }
  0x3b   : > { %864 = vmatprep.mubr.msk.f32.mxu0 %vm310_vm0, %v295_v5  ;;  %v298_v9 = vld [vmem:[%s292_s21 + $0x18] sm:$0xff]  ;;  %927 = vmatprep.subr.bf16.mxu1 %v926_v15  ;;  %p1061_p6 = scmp.ne.s32.totalorder %s1324_s8, %s1060_s28  ;;  %p1390_p9 = scmp.ne.s32.totalorder %s1383_s11, 0 }
  0x3c   : > { %921 = vmatpush3.bf16.msra.mxu0 %v918_v6  ;;  %s1131_s20 = smov [#allocation5]  }
  0x3d   : > { %p1062_p10 = pnand %p1061_p6, %p1390_p9  ;;  %s1064_s16 = sshll.u32 %s1131_s20, 4  ;;  %s1065_s16 = int_to_ptr.vmem [resolvable:$false] %s1064_s16 }
  0x3e   : > { %929 = vmatpush3.bf16.msra.mxu1 %v926_v15  ;;  %s1066_s15 = scalar_lea.vmem %s1065_s16, 1024  ;;  %p1067_p2 = scmp.lt.s32.totalorder %s1324_s8, %s1065_s16 }
  0x3f   : > { %865 = vmatmul.mubr.msk.f32.vlgmr.msra.gmra.mrb[0].mxu0 %vm310_vm0, %v296_v7  ;;  %931 = vmatprep.subr.bf16.mxu1 %v930_v18  ;;  %p1063_p12 = pneg %p1062_p10  ;;  %p1068_p3 = scmp.lt.s32.totalorder %s1066_s15, %s1060_s28 }
  0x40   : > { %867 = vmatprep.mubr.msk.f32.mxu0 %vm310_vm0, %v297_v8 }
  0x41   : > { %p1069_p4 = por %p1068_p3, %p1067_p2 }
  0x42   : > { %933 = vmatpush3.bf16.msra.mxu1 %v930_v18 }
  0x43   : > { %868 = vmatmul.mubr.msk.f32.gmra.mrb[2].mxu0 %vm310_vm0, %v298_v9  ;;  %935 = vmatprep.subr.bf16.mxu1 %v934_v21  ;;  %p1070_p7 = pnand %p1069_p4, %p1063_p12 }
  0x46   : > { %937 = vmatpush3.bf16.msra.mxu1 %v934_v21 }
 0x112   : > { %v866_v23 = vpop.f32.mrb[0].mxu0 }
 0x113   : > { %v395_v24 = vadd.f32 %v866_v23, %v803_v22  ;;  %v389_v25 = vpop.f32.mrb[1].mxu0 }
 0x114   : > { %v390_v26 = vadd.f32 %v803_v22, %v389_v25  ;;  %v591_v25 = vld [vmem:[#allocation2 + $0x8] sm:$0xff] }
 0x115   : > { %v414_v27 = vmul.f32 0.70710677, %v395_v24  ;;  %v409_v40 = vmul.f32 0.5, %v395_v24  ;;  %v590_v24 = vld [vmem:[#allocation2] sm:$0xff] }
 0x116   : > { %v413_v28 = vmul.f32 0.70710677, %v390_v26  ;;  %v869_v29 = vpop.f32.mrb[2].mxu0  ;;  %v408_v38 = vmul.f32 0.5, %v390_v26  ;;  %v938_v26 = vpack.c.bf16 %v591_v25, %v590_v24 }
 0x117   : > { %1008 = verf.f32 %v414_v27  ;;  %v405_v30 = vadd.f32 %v869_v29, %v803_v22  ;;  %v399_v31 = vpop.f32.mrb[3].mxu0  ;;  %v592_v27 = vld [vmem:[#allocation2 + $0x10] sm:$0xff] }
 0x118   : > { %1010 = verf.f32 %v413_v28  ;;  %v400_v32 = vadd.f32 %v803_v22, %v399_v31  ;;  %939 = vmatprep.subr.bf16.mxu0 %v938_v26  ;;  %v593_v28 = vld [vmem:[#allocation2 + $0x18] sm:$0xff]  ;;  %v595_v31 = vld [vmem:[#allocation2 + $0x28] sm:$0xff] }
 0x119   : > { %v416_v33 = vmul.f32 0.70710677, %v405_v30  ;;  %v411_v48 = vmul.f32 0.5, %v405_v30  ;;  %941 = vmatpush3.bf16.msra.mxu0 %v938_v26  ;;  %v942_v29 = vpack.c.bf16 %v593_v28, %v592_v27  ;;  %v594_v30 = vld [vmem:[#allocation2 + $0x20] sm:$0xff] }
 0x11a   : > { %v415_v34 = vmul.f32 0.70710677, %v400_v32  ;;  %v410_v46 = vmul.f32 0.5, %v400_v32  ;;  %v946_v32 = vpack.c.bf16 %v595_v31, %v594_v30 }
 0x11b   : > { %1012 = verf.f32 %v416_v33  ;;  %943 = vmatprep.subr.bf16.mxu0 %v942_v29  ;;  %v596_v33 = vld [vmem:[#allocation2 + $0x30] sm:$0xff] }
 0x11c   : > { %1014 = verf.f32 %v415_v34  ;;  %v597_v34 = vld [vmem:[#allocation2 + $0x38] sm:$0xff] }
 0x11d   : > { %945 = vmatpush3.bf16.msra.mxu0 %v942_v29 }
 0x11e   : > { %947 = vmatprep.subr.bf16.mxu0 %v946_v32 }
 0x121   : > { %v1009_v35 = vpop.eup %1008  ;;  %949 = vmatpush3.bf16.msra.mxu0 %v946_v32 }
 0x122   : > { %v1011_v36 = vpop.eup %1010  ;;  %v422_v37 = vadd.f32 1.0, %v1009_v35  ;;  %v950_v35 = vpack.c.bf16 %v597_v34, %v596_v33 }
 0x123   : > { %v421_v39 = vadd.f32 1.0, %v1011_v36 }
 0x124   : > { %v426_v44 = vmul.f32 %v422_v37, %v409_v40  ;;  %951 = vmatprep.subr.bf16.mxu0 %v950_v35 }
 0x125   : > { %v1013_v41 = vpop.eup %1012  ;;  %v425_v42 = vmul.f32 %v421_v39, %v408_v38  ;;  %953 = vmatpush3.bf16.msra.mxu0 %v950_v35 }
 0x126   : > { %v1015_v43 = vpop.eup %1014  ;;  %v424_v45 = vadd.f32 1.0, %v1013_v41 }
 0x127   : > { %v423_v47 = vadd.f32 1.0, %v1015_v43  ;;  %886 = vmatprep.mubr.msk.f32.mxu1 %vm444_vm1, %v425_v42 }
 0x128   : > { %887 = vmatmul.mubr.msk.f32.vlgmr.msra.gmra.mrb[0].mxu1 %vm444_vm1, %v426_v44  ;;  %v428_v50 = vmul.f32 %v424_v45, %v411_v48 }
 0x129   : > { %v427_v49 = vmul.f32 %v423_v47, %v410_v46 }
 0x12b   : > { %889 = vmatprep.mubr.msk.f32.mxu1 %vm444_vm1, %v427_v49 }
 0x12c   : > { %890 = vmatmul.mubr.msk.f32.gmra.mrb[2].mxu1 %vm444_vm1, %v428_v50 }
 0x1fb   : > { %v888_v52 = vpop.f32.mrb[0].mxu1 }
 0x1fc   : > { %v529_v53 = vadd.f32 %v888_v52, %v808_v51  ;;  %v523_v54 = vpop.f32.mrb[1].mxu1  ;;  %v813_v52 = vld [vmem:[%s1378_s6] ss:$0 sm:$0xff] }
 0x1fd   : > { %v524_v55 = vadd.f32 %v808_v51, %v523_v54 }
 0x1fe   : > { %v547_v56 = vmul.f32 0.70710677, %v529_v53  ;;  %v543_v3 = vmul.f32 0.5, %v529_v53 }
 0x1ff   : > { %v546_v57 = vmul.f32 0.70710677, %v524_v55  ;;  %v891_v58 = vpop.f32.mrb[2].mxu1  ;;  %v542_v4 = vmul.f32 0.5, %v524_v55 }
 0x200   : > { %1016 = verf.f32 %v547_v56  ;;  %v539_v59 = vadd.f32 %v891_v58, %v808_v51  ;;  %v533_v60 = vpop.f32.mrb[3].mxu1 }
 0x201   : > { %1018 = verf.f32 %v546_v57  ;;  %v534_v61 = vadd.f32 %v808_v51, %v533_v60 }
 0x202   : > { %v549_v62 = vmul.f32 0.70710677, %v539_v59  ;;  %v545_v11 = vmul.f32 0.5, %v539_v59 }
 0x203   : > { %v548_v63 = vmul.f32 0.70710677, %v534_v61  ;;  %v544_v12 = vmul.f32 0.5, %v534_v61 }
 0x204   : > { %1020 = verf.f32 %v549_v62 }
 0x205   : > { %1022 = verf.f32 %v548_v63 }
 0x20a   : > { %v1017_v0 = vpop.eup %1016 }
 0x20b   : > { %v1019_v1 = vpop.eup %1018  ;;  %v555_v2 = vadd.f32 1.0, %v1017_v0 }
 0x20c   : > { %v554_v5 = vadd.f32 1.0, %v1019_v1 }
 0x20d   : > { %v559_v8 = vmul.f32 %v555_v2, %v543_v3 }
 0x20e   : > { %v1021_v6 = vpop.eup %1020  ;;  %v558_v7 = vmul.f32 %v554_v5, %v542_v4 }
 0x20f   : > { %v1023_v9 = vpop.eup %1022  ;;  %v557_v10 = vadd.f32 1.0, %v1021_v6  ;;  %v563_v17 = vmul.f32 %v559_v8, %v559_v8 }
 0x210   : > { %v562_v13 = vmul.f32 %v558_v7, %v558_v7  ;;  %v556_v14 = vadd.f32 1.0, %v1023_v9 }
 0x211   : > { %v561_v18 = vmul.f32 %v557_v10, %v545_v11  ;;  %v569_v21 = vsel %vm444_vm1, %v563_v17, 0.0 }
 0x212   : > { %v566_v15 = vsel %vm444_vm1, %v562_v13, 0.0  ;;  %v560_v16 = vmul.f32 %v556_v14, %v544_v12 }
 0x213   : > { %567 = vadd.xlane.f32.xlu0 %v566_v15  ;;  %v565_v22 = vmul.f32 %v561_v18, %v561_v18 }
 0x214   : > { %v564_v19 = vmul.f32 %v560_v16, %v560_v16 }
 0x215   : > { %v575_v23 = vsel %vm444_vm1, %v565_v22, 0.0 }
 0x216   : > { %v572_v20 = vsel %vm444_vm1, %v564_v19, 0.0 }
 0x217   : > { %573 = vadd.xlane.f32.xlu1 %v572_v20  ;;  %570 = vadd.xlane.f32.xlu0 %v569_v21 }
 0x21b   : > { %576 = vadd.xlane.f32.xlu1 %v575_v23 }
 0x2a0   : > { %v568_v36 = vpop.xlane.xlu0 %567 }
 0x2a1   : > { %v578_v37 = vmax.f32 %v568_v36, 1e-12 }
 0x2a3   : > { %1024 = vrsqrt.f32 %v578_v37 }
 0x2a4   : > { %v574_v38 = vpop.xlane.xlu1 %573  ;;  %v571_v39 = vpop.xlane.xlu0 %570 }
 0x2a5   : > { %v580_v40 = vmax.f32 %v574_v38, 1e-12  ;;  %v579_v41 = vmax.f32 %v571_v39, 1e-12 }
 0x2a7   : > { %1026 = vrsqrt.f32 %v580_v40 }
 0x2a8   : > { %1028 = vrsqrt.f32 %v579_v41  ;;  %v577_v42 = vpop.xlane.xlu1 %576 }
 0x2a9   : > { %v581_v43 = vmax.f32 %v577_v42, 1e-12 }
 0x2ab   : > { %1030 = vrsqrt.f32 %v581_v43 }
 0x2ad   : > { %v1025_v44 = vpop.eup %1024 }
 0x2ae   : > { %v586_v45 = vmul.f32 %v1025_v44, %v558_v7 }
 0x2b0   : > { %908 = vmatprep.mubr.msk.f32.mxu0 %vm444_vm1, %v586_v45 }
 0x2b1   : > { %v1027_v46 = vpop.eup %1026 }
 0x2b2   : > { %v1029_v47 = vpop.eup %1028  ;;  %v588_v48 = vmul.f32 %v1027_v46, %v560_v16 }
 0x2b3   : > { %v587_v49 = vmul.f32 %v1029_v47, %v559_v8 }
 0x2b5   : > { %v1031_v50 = vpop.eup %1030  ;;  %909 = vmatmul.mubr.msk.f32.vlgmr.msra.gmra.mrb[4].mxu0 %vm444_vm1, %v587_v49 }
 0x2b6   : > { %911 = vmatprep.mubr.msk.f32.mxu0 %vm444_vm1, %v588_v48  ;;  %v589_v51 = vmul.f32 %v1031_v50, %v561_v18 }
 0x2b9   : > { %912 = vmatmul.mubr.msk.f32.gmra.mrb[6].mxu0 %vm444_vm1, %v589_v51 }
 0x388   : > { %v910_v53 = vpop.f32.mrb[4].mxu0 }
 0x389   : > { %v689_v54 = vadd.f32 %v910_v53, %v813_v52  ;;  %v683_v55 = vpop.f32.mrb[5].mxu0 }
 0x38a   : > { %v684_v56 = vadd.f32 %v813_v52, %v683_v55 }
 0x38b   : > { %703 = vst [vmem:[%s287_s29 + $0x8] sm:$0xff] %v689_v54 }
 0x38c   : > { %702 = vst [vmem:[%s287_s29] sm:$0xff] %v684_v56  ;;  %v913_v57 = vpop.f32.mrb[6].mxu0 }
 0x38d   : > { %v699_v58 = vadd.f32 %v913_v57, %v813_v52  ;;  %v693_v59 = vpop.f32.mrb[7].mxu0 }
 0x38e   : > { %v694_v60 = vadd.f32 %v813_v52, %v693_v59 }
 0x38f   : > { %705 = vst [vmem:[%s287_s29 + $0x18] sm:$0xff] %v699_v58 }
 0x390   : > { %704 = vst [vmem:[%s287_s29 + $0x10] sm:$0xff] %v694_v60 }
 0x391   : > { %1073 = shalt.err (!%p1070_p7)
}
 0x392   : > { %s1074_s22 = scalar_lea.hbm %s1329_s18, 512  ;;  %s1078_s23 = scalar_lea.hbm %s1379_s7, 1024 }
 0x393   : > { %p1075_p8 = scmp.ne.s32.totalorder %s1329_s18, %s1074_s22  ;;  %p1079_p1 = scmp.lt.u32.totalorder %s1329_s18, %s1379_s7 }
 0x394   : > { %p1080_p0 = scmp.lt.u32.totalorder %s1078_s23, %s1074_s22  ;;  %p1082_p6 = scmp.lt.u32.totalorder %s1074_s22, %s1329_s18 }
 0x395   : > { %p1076_p11 = pnand %p1075_p8, %p1390_p9 }
 0x396   : > { %p1081_p5 = por %p1080_p0, %p1079_p1 }
 0x397   : > { %p1077_p13 = pneg %p1076_p11 }
 0x398   : > { %p1083_p10 = por %p1082_p6, %p1081_p5 }
 0x39a   : > { %p1084_p12 = pnand %p1083_p10, %p1077_p13 }
 0x39c   : > { %1087 = shalt.err (!%p1084_p12)
}
 0x39d   : > { %s1132_s14 = smov 128   ;;  %s1133_s17 = smov 8  }
 0x39e   : > { %958 = dma.vmem_to_hbm [thread:$0]  (%p1390_p9), %s1324_s8, 512, %s1329_s18, %s1331_s19, %s1132_s14, %s1132_s14, %s1133_s17  }
 0x39f PF: > { %p970_p2 = scmp.ge.s32.totalorder %s1126_s27, 2  ;;  %s735_s28 = sand.u32 1, %s1114_s24  }
 0x3a0   : > { %p1391_p3 = scmp.ne.s32.totalorder %s1384_s12, 0  ;;  %s736_s20 = scalar_lea.sflag [#allocation4], %s735_s28 }
 0x3a2   : > { %p965_p4 = pnand %p970_p2, %p1391_p3 }
 0x3a4   : > { %1109 = dma.done.wait (!%p965_p4), %s736_s20, 512  }
 0x3a5   : > { %1111 = vsyncadd (!%p965_p4), %s736_s20, 4294966784  ;;  %p18_p7 = scmp.ge.s32.totalorder %s1199_s30, 4   ;;  %s1392_s24 = smov %s1118_s25 }
 0x3a6   : > { %s1393_s25 = smov %s1122_s26  ;;  %s1394_s26 = smov %s1210_s10 }
 0x3a7   : > { %s1395_s27 = smov %s1199_s30  ;;  %20 = sbr.rel (!%p18_p7) target bundleno = 4 (0x4), region = 88 }
 0x3ae   :  { %741 = vsyncpa [#allocation3], 1 }
 0x3af   :  { %743 = vsyncpa [#allocation3 + $0x1], 1 }
 0x3b0   :  { %744 = vsyncpa [#allocation4], 1 }
 0x3b1   :  { %746 = vsyncpa [#allocation4 + $0x1], 1 }

</bundles_post_ra>
